<compile_context>
chip_gen: v6e
topology: v6e:2x2x1
jax: 0.10.0
libtpu: 0.0.40
codegen_flags: <defaults>
</compile_context>

<pallas_src>
import numpy as np
import jax
import jax.numpy as jnp
from jax.experimental import pallas as pl
from jax.experimental.pallas import tpu as pltpu


# ------------------------------ fused kernel --------------------------------

def _make_fused_kernel(cout, q):
    """cout = conv output channels, q = N*Ho*Wo (pool-slab width in lanes)."""

    def kernel(a_ref, wm_ref, bc_ref, wfc_ref, bfc_ref, conv_ref, fc_ref):
        # conv1: (Cout, Kpad) @ (Kpad, N*H*W) + bias -> lane-dense (Cout, 4*q).
        conv = (jnp.dot(wm_ref[...], a_ref[...],
                        preferred_element_type=jnp.float32)
                + bc_ref[...])
        conv_ref[...] = conv                       # extracted 'conv1' activation

        # relu1 (VPU; filler under the MXU/DMA slots).
        r = jnp.maximum(conv, 0.0)

        # pool1: columns ordered (dh, dw, n, ho, wo) => the 4 window taps are 4
        # contiguous 128-lane-aligned slabs -> pure elementwise maxima (no XLU).
        pooled = jnp.maximum(
            jnp.maximum(r[:, 0 * q:1 * q], r[:, 1 * q:2 * q]),
            jnp.maximum(r[:, 2 * q:3 * q], r[:, 3 * q:4 * q]),
        )                                          # (Cout, N*S)

        # fc as ONE matmul: move the Cout sublanes into lanes (each piece is a
        # full 128-lane slab, so the concat stays lane-aligned), then a single
        # K = Cout*N*S streamed MXU dot against the 2-D block-diagonal-over-
        # batch weight slab.  Replaces 8 serialized M=1 dots + dependent adds.
        flat = jnp.concatenate([pooled[c:c + 1, :] for c in range(cout)],
                               axis=1)             # (1, Cout*N*S)
        fc_ref[...] = (jnp.dot(flat, wfc_ref[...],
                               preferred_element_type=jnp.float32)
                       + bfc_ref[...])             # (1, N*Ofc)

    return kernel


# ------------------------- host-side parameter packing ----------------------

def pack_params(w_conv, b_conv, w_fc, b_fc, n_batch, height, width):
    """One-time host-side re-layout of the weights into kernel-friendly shapes."""
    cout, cin, kh, kw = w_conv.shape
    assert (kh, kw) == (3, 3), "submodule conv1 is a 3x3 SAME convolution"
    assert height % 2 == 0 and width % 2 == 0, "pool1 (2x2/2) needs even H, W"
    ho, wo = height // 2, width // 2
    s = ho * wo
    q = n_batch * s
    assert q % 128 == 0, "N*Ho*Wo must be a multiple of 128 (lane alignment)"
    ofc = w_fc.shape[0]
    assert w_fc.shape[1] == cout * s

    k = cin * 9
    kpad = ((k + 7) // 8) * 8                     # 36 -> 40 (sublane aligned)
    w_mat = np.zeros((cout, kpad), np.float32)
    w_mat[:, :k] = np.asarray(w_conv, np.float32).reshape(cout, k)
    b_c = np.asarray(b_conv, np.float32).reshape(cout, 1)

    # Wfc[o, c*S + s] -> (c, s, o), then one 2-D (Cout*N*S, N*Ofc) slab that is
    # block-diagonal over the batch index carried in the lanes of `flat`.
    wfc_cso = np.transpose(np.asarray(w_fc, np.float32).reshape(ofc, cout, s),
                           (1, 2, 0))                        # (cout, s, ofc)
    wfc2 = np.zeros((cout, n_batch, s, n_batch, ofc), np.float32)
    for n in range(n_batch):
        wfc2[:, n, :, n, :] = wfc_cso
    wfc2 = wfc2.reshape(cout * n_batch * s, n_batch * ofc)   # (Cout*N*S, N*Ofc)
    b_fc_rep = np.tile(np.asarray(b_fc, np.float32),
                       n_batch).reshape(1, n_batch * ofc)

    return dict(w_mat=jnp.asarray(w_mat), b_c=jnp.asarray(b_c),
                wfc2=jnp.asarray(wfc2), b_fc=jnp.asarray(b_fc_rep))


# ------------------------------ fused forward -------------------------------

def fused_forward(x, w_mat, b_c, wfc2, b_fc_rep):
    """conv1(3x3 SAME) -> relu1 -> pool1(2x2/2) -> fc, fused in one Pallas call.

    Returns (conv1 activation in NCHW, fc output (N, Ofc))."""
    N, Cin, H, W = x.shape
    Cout, Kpad = w_mat.shape
    assert H % 2 == 0 and W % 2 == 0
    Ho, Wo = H // 2, W // 2
    S = Ho * Wo
    q = N * S                                     # pool-slab width in lanes
    K = Cin * 9
    Ofc = wfc2.shape[1] // N
    assert q % 128 == 0, "N*Ho*Wo must be a multiple of 128 (lane alignment)"
    assert K <= Kpad and Kpad % 8 == 0
    assert wfc2.shape[0] == Cout * q

    # im2col^T with rows (c, kh, kw) and columns (dh, dw, n, ho, wo): each
    # (kh, kw, dh, dw) tap is one stride-2 slice of the (c, n)-swapped padded
    # input, so no large multi-dim transpose is materialized before the kernel.
    # TODO(synk): building the 9 taps in-kernel via pltpu.roll would need
    # lane-splitting reshapes Mosaic does not lower cleanly, so it stays here.
    xpc = jnp.pad(x, ((0, 0), (0, 0), (1, 1), (1, 1))).transpose(1, 0, 2, 3)
    row_blocks = []
    for kh in range(3):
        for kw in range(3):
            taps = [xpc[:, :, kh + dh:kh + dh + 2 * Ho - 1:2,
                           kw + dw:kw + dw + 2 * Wo - 1:2]
                    for dh in range(2) for dw in range(2)]   # 4 x (Cin,N,Ho,Wo)
            row_blocks.append(jnp.stack(taps, axis=1).reshape(Cin, 4 * q))
    a_t = jnp.stack(row_blocks, axis=1).reshape(K, 4 * q)    # rows = (c,kh,kw)
    a_t = jnp.pad(a_t, ((0, Kpad - K), (0, 0)))              # (Kpad, N*H*W)

    kernel = _make_fused_kernel(Cout, q)
    conv_mat, fc_flat = pl.pallas_call(
        kernel,
        out_shape=(
            jax.ShapeDtypeStruct((Cout, 4 * q), jnp.float32),  # lane-dense conv1
            jax.ShapeDtypeStruct((1, N * Ofc), jnp.float32),   # fc, batch in lanes
        ),
        grid=(1,),
        in_specs=[
            pl.BlockSpec((Kpad, 4 * q), lambda i: (0, 0)),
            pl.BlockSpec((Cout, Kpad), lambda i: (0, 0)),
            pl.BlockSpec((Cout, 1), lambda i: (0, 0)),
            pl.BlockSpec((Cout * q, N * Ofc), lambda i: (0, 0)),
            pl.BlockSpec((1, N * Ofc), lambda i: (0, 0)),
        ],
        out_specs=(
            pl.BlockSpec((Cout, 4 * q), lambda i: (0, 0)),
            pl.BlockSpec((1, N * Ofc), lambda i: (0, 0)),
        ),
        compiler_params=pltpu.CompilerParams(
            dimension_semantics=("arbitrary",)),
    )(a_t, w_mat, b_c, wfc2, b_fc_rep)

    # Tiny (16 KB / 128 B) relayouts back to the module's conventions.
    conv1 = (conv_mat.reshape(Cout, 2, 2, N, Ho, Wo)
             .transpose(3, 0, 4, 1, 5, 2)
             .reshape(N, Cout, H, W))
    fc = fc_flat.reshape(N, Ofc)
    return conv1, fc


# --------------------------- FeatureExtractor port ---------------------------

class FeatureExtractor:
    """Mirrors the PyTorch wrapper: run the submodule's layers in order
    (conv1 -> relu1 -> pool1 -> flatten -> fc) and collect activations of the
    layers named in `extracted_layers`, in layer order.  The forward itself is
    one fused Pallas kernel; relu1 / pool1 activations (cheap derivations of
    conv1) are reconstructed only if actually requested."""

    _LAYER_ORDER = ('conv1', 'relu1', 'pool1', 'fc')

    def __init__(self, packed_params, extracted_layers):
        self.params = packed_params
        self.extracted_layers = list(extracted_layers)
        self._fwd = jax.jit(fused_forward)

    def __call__(self, x):
        conv1, fc = self._fwd(x, self.params['w_mat'], self.params['b_c'],
                              self.params['wfc2'], self.params['b_fc'])
        acts = {'conv1': conv1, 'fc': fc}
        if 'relu1' in self.extracted_layers or 'pool1' in self.extracted_layers:
            relu1 = jnp.maximum(conv1, 0.0)
            acts['relu1'] = relu1
            N, C, H, W = relu1.shape
            acts['pool1'] = jnp.max(
                relu1.reshape(N, C, H // 2, 2, W // 2, 2), axis=(3, 5))
        return [acts[name] for name in self._LAYER_ORDER
                if name in self.extracted_layers]


# ----------------------------------- main ------------------------------------

if __name__ == "__main__":
    key = jax.random.PRNGKey(0)
    kx, kcw, kcb, kfw, kfb = jax.random.split(key, 5)

    # Input: batch=2, channels=4, spatial=16x16 (NCHW, like PyTorch).
    x = jax.random.normal(kx, (2, 4, 16, 16), dtype=jnp.float32)

    # Deterministic synthetic submodule parameters.
    w_conv = 0.1 * jax.random.normal(kcw, (8, 4, 3, 3), dtype=jnp.float32)    # OIHW
    b_conv = 0.1 * jax.random.normal(kcb, (8,), dtype=jnp.float32)
    w_fc = 0.05 * jax.random.normal(kfw, (16, 8 * 8 * 8), dtype=jnp.float32)  # (out, in)
    b_fc = 0.05 * jax.random.normal(kfb, (16,), dtype=jnp.float32)

    packed = pack_params(w_conv, b_conv, w_fc, b_fc, n_batch=2, height=16, width=16)
    extractor = FeatureExtractor(packed, extracted_layers=['conv1', 'fc'])

    outs = extractor(x)
    outs = [jax.block_until_ready(o) for o in outs]

    # Pure-JAX reference (no Pallas) for correctness.
    ref_conv = jax.lax.conv_general_dilated(
        x, w_conv, window_strides=(1, 1), padding='SAME',
        dimension_numbers=('NCHW', 'OIHW', 'NCHW')) + b_conv[None, :, None, None]
    ref_relu = jnp.maximum(ref_conv, 0.0)
    ref_pool = jnp.max(ref_relu.reshape(2, 8, 8, 2, 8, 2), axis=(3, 5))
    ref_fc = ref_pool.reshape(2, -1) @ w_fc.T + b_fc

    np.testing.assert_allclose(np.asarray(outs[0]), np.asarray(ref_conv),
                               rtol=1e-3, atol=1e-3)
    np.testing.assert_allclose(np.asarray(outs[1]), np.asarray(ref_fc),
                               rtol=1e-3, atol=1e-3)
    assert outs[0].shape == (2, 8, 16, 16) and outs[1].shape == (2, 16)

    print("KERNEL_OK")
</pallas_src>

<mosaic_0001>
module attributes {stable_mosaic.version = 11 : i64} {
  func.func @kernel(%arg0: i32, %arg1: memref<40x512xf32, #tpu.memory_space<vmem>>, %arg2: memref<8x40xf32, #tpu.memory_space<vmem>>, %arg3: memref<8x1xf32, #tpu.memory_space<vmem>>, %arg4: memref<1024x32xf32, #tpu.memory_space<vmem>>, %arg5: memref<1x32xf32, #tpu.memory_space<vmem>>, %arg6: memref<8x512xf32, #tpu.memory_space<vmem>>, %arg7: memref<1x32xf32, #tpu.memory_space<vmem>>) attributes {dimension_semantics = [#tpu.dimension_semantics<arbitrary>], iteration_bounds = array<i64: 1>, scalar_prefetch = 0 : i64, scratch_operands = 0 : i64, tpu.core_type = #tpu.core_type<tc>, window_params = [{pipeline_mode = #tpu.pipeline_mode<synchronous>, transform_indices = @transform_0, window_bounds = array<i64: 40, 512>}, {pipeline_mode = #tpu.pipeline_mode<synchronous>, transform_indices = @transform_1, window_bounds = array<i64: 8, 40>}, {pipeline_mode = #tpu.pipeline_mode<synchronous>, transform_indices = @transform_2, window_bounds = array<i64: 8, 1>}, {pipeline_mode = #tpu.pipeline_mode<synchronous>, transform_indices = @transform_3, window_bounds = array<i64: 1024, 32>}, {pipeline_mode = #tpu.pipeline_mode<synchronous>, transform_indices = @transform_4, window_bounds = array<i64: 1, 32>}, {pipeline_mode = #tpu.pipeline_mode<synchronous>, transform_indices = @transform_5, window_bounds = array<i64: 8, 512>}, {pipeline_mode = #tpu.pipeline_mode<synchronous>, transform_indices = @transform_6, window_bounds = array<i64: 1, 32>}]} {
    %c0 = arith.constant 0 : index
    %c0_0 = arith.constant 0 : index
    %0 = vector.load %arg2[%c0, %c0_0] : memref<8x40xf32, #tpu.memory_space<vmem>>, vector<8x40xf32>
    %c0_1 = arith.constant 0 : index
    %c0_2 = arith.constant 0 : index
    %1 = vector.load %arg1[%c0_1, %c0_2] : memref<40x512xf32, #tpu.memory_space<vmem>>, vector<40x512xf32>
    %cst = arith.constant dense<0.000000e+00> : vector<8x512xf32>
    %2 = tpu.matmul %0, %1, %cst {dimension_numbers = #tpu.dot_dimension_numbers<[1], [0], [0], [1], [0, 0, 1, 1], [], []>} : vector<8x40xf32>, vector<40x512xf32>, vector<8x512xf32> -> vector<8x512xf32>
    %c0_3 = arith.constant 0 : index
    %c0_4 = arith.constant 0 : index
    %3 = vector.load %arg3[%c0_3, %c0_4] : memref<8x1xf32, #tpu.memory_space<vmem>>, vector<8x1xf32>
    %4 = vector.broadcast %3 : vector<8x1xf32> to vector<8x512xf32>
    %5 = arith.addf %2, %4 : vector<8x512xf32>
    %c0_5 = arith.constant 0 : index
    %c0_6 = arith.constant 0 : index
    %6 = vector.load %arg6[%c0_5, %c0_6] : memref<8x512xf32, #tpu.memory_space<vmem>>, vector<8x512xf32>
    tpu.vector_store %arg6[%c0_5, %c0_6], %5 {strides = array<i32>} : memref<8x512xf32, #tpu.memory_space<vmem>>, vector<8x512xf32>,
    %cst_7 = arith.constant 0.000000e+00 : f32
    %7 = vector.broadcast %cst_7 : f32 to vector<8x512xf32>
    %8 = arith.maximumf %5, %7 : vector<8x512xf32>
    %9 = vector.extract_strided_slice %8 {offsets = [0, 0], sizes = [8, 128], strides = [1, 1]} : vector<8x512xf32> to vector<8x128xf32>
    %10 = vector.extract_strided_slice %8 {offsets = [0, 128], sizes = [8, 128], strides = [1, 1]} : vector<8x512xf32> to vector<8x128xf32>
    %11 = arith.maximumf %9, %10 : vector<8x128xf32>
    %12 = vector.extract_strided_slice %8 {offsets = [0, 256], sizes = [8, 128], strides = [1, 1]} : vector<8x512xf32> to vector<8x128xf32>
    %13 = vector.extract_strided_slice %8 {offsets = [0, 384], sizes = [8, 128], strides = [1, 1]} : vector<8x512xf32> to vector<8x128xf32>
    %14 = arith.maximumf %12, %13 : vector<8x128xf32>
    %15 = arith.maximumf %11, %14 : vector<8x128xf32>
    %16 = vector.extract_strided_slice %15 {offsets = [0, 0], sizes = [1, 128], strides = [1, 1]} : vector<8x128xf32> to vector<1x128xf32>
    %17 = vector.extract_strided_slice %15 {offsets = [1, 0], sizes = [1, 128], strides = [1, 1]} : vector<8x128xf32> to vector<1x128xf32>
    %18 = vector.extract_strided_slice %15 {offsets = [2, 0], sizes = [1, 128], strides = [1, 1]} : vector<8x128xf32> to vector<1x128xf32>
    %19 = vector.extract_strided_slice %15 {offsets = [3, 0], sizes = [1, 128], strides = [1, 1]} : vector<8x128xf32> to vector<1x128xf32>
    %20 = vector.extract_strided_slice %15 {offsets = [4, 0], sizes = [1, 128], strides = [1, 1]} : vector<8x128xf32> to vector<1x128xf32>
    %21 = vector.extract_strided_slice %15 {offsets = [5, 0], sizes = [1, 128], strides = [1, 1]} : vector<8x128xf32> to vector<1x128xf32>
    %22 = vector.extract_strided_slice %15 {offsets = [6, 0], sizes = [1, 128], strides = [1, 1]} : vector<8x128xf32> to vector<1x128xf32>
    %23 = vector.extract_strided_slice %15 {offsets = [7, 0], sizes = [1, 128], strides = [1, 1]} : vector<8x128xf32> to vector<1x128xf32>
    %24 = tpu.concatenate %16, %17, %18, %19, %20, %21, %22, %23 in 1 : vector<1x128xf32>, vector<1x128xf32>, vector<1x128xf32>, vector<1x128xf32>, vector<1x128xf32>, vector<1x128xf32>, vector<1x128xf32>, vector<1x128xf32> -> vector<1x1024xf32>
    %c0_8 = arith.constant 0 : index
    %c0_9 = arith.constant 0 : index
    %25 = vector.load %arg4[%c0_8, %c0_9] : memref<1024x32xf32, #tpu.memory_space<vmem>>, vector<1024x32xf32>
    %cst_10 = arith.constant dense<0.000000e+00> : vector<1x32xf32>
    %26 = tpu.matmul %24, %25, %cst_10 {dimension_numbers = #tpu.dot_dimension_numbers<[1], [0], [0], [1], [0, 0, 1, 1], [], []>} : vector<1x1024xf32>, vector<1024x32xf32>, vector<1x32xf32> -> vector<1x32xf32>
    %c0_11 = arith.constant 0 : index
    %c0_12 = arith.constant 0 : index
    %27 = vector.load %arg5[%c0_11, %c0_12] : memref<1x32xf32, #tpu.memory_space<vmem>>, vector<1x32xf32>
    %28 = arith.addf %26, %27 : vector<1x32xf32>
    %c0_13 = arith.constant 0 : index
    %c0_14 = arith.constant 0 : index
    %29 = vector.load %arg7[%c0_13, %c0_14] : memref<1x32xf32, #tpu.memory_space<vmem>>, vector<1x32xf32>
    tpu.vector_store %arg7[%c0_13, %c0_14], %28 {strides = array<i32>} : memref<1x32xf32, #tpu.memory_space<vmem>>, vector<1x32xf32>,
    return
  }
  func.func @transform_0(%arg0: i32) -> (i32, i32) {
    %c0_i32 = arith.constant 0 : i32
    %c0_i32_0 = arith.constant 0 : i32
    %c0_i32_1 = arith.constant 0 : i32
    return %c0_i32, %c0_i32_0 : i32, i32
  }
  func.func @transform_1(%arg0: i32) -> (i32, i32) {
    %c0_i32 = arith.constant 0 : i32
    %c0_i32_0 = arith.constant 0 : i32
    %c0_i32_1 = arith.constant 0 : i32
    return %c0_i32, %c0_i32_0 : i32, i32
  }
  func.func @transform_2(%arg0: i32) -> (i32, i32) {
    %c0_i32 = arith.constant 0 : i32
    %c0_i32_0 = arith.constant 0 : i32
    %c0_i32_1 = arith.constant 0 : i32
    return %c0_i32, %c0_i32_0 : i32, i32
  }
  func.func @transform_3(%arg0: i32) -> (i32, i32) {
    %c0_i32 = arith.constant 0 : i32
    %c0_i32_0 = arith.constant 0 : i32
    %c0_i32_1 = arith.constant 0 : i32
    return %c0_i32, %c0_i32_0 : i32, i32
  }
  func.func @transform_4(%arg0: i32) -> (i32, i32) {
    %c0_i32 = arith.constant 0 : i32
    %c0_i32_0 = arith.constant 0 : i32
    %c0_i32_1 = arith.constant 0 : i32
    return %c0_i32, %c0_i32_0 : i32, i32
  }
  func.func @transform_5(%arg0: i32) -> (i32, i32) {
    %c0_i32 = arith.constant 0 : i32
    %c0_i32_0 = arith.constant 0 : i32
    %c0_i32_1 = arith.constant 0 : i32
    return %c0_i32, %c0_i32_0 : i32, i32
  }
  func.func @transform_6(%arg0: i32) -> (i32, i32) {
    %c0_i32 = arith.constant 0 : i32
    %c0_i32_0 = arith.constant 0 : i32
    %c0_i32_1 = arith.constant 0 : i32
    return %c0_i32, %c0_i32_0 : i32, i32
  }
}

</mosaic_0001>

<bundles_post_ra>
// kernel: fused_forward.1
= control target key start
LH: loop header
LB: loop body
LE: loop exit
PB: predicated region body
PF: predicated region fallthrough
CT: control target
= control target key end

     0   :  { %v785_v3 = vmov 0.0   ;;  %vm49_vm0 = vcmask 326656   ;;  %v786_v27 = vmov 0   ;;  %vm630_vm1 = vcmask 253952   ;;  %s1300_s0 = inlined_call_operand.vmem [shape: f32[40,512], index: 0, kind: input, shape index: {}]   ;;  %s1301_s1 = inlined_call_operand.vmem [shape: f32[8,40], index: 1, kind: input, shape index: {}]   ;;  %s1302_s3 = inlined_call_operand.vmem [shape: f32[1024,32], index: 3, kind: input, shape index: {}]   ;;  %s1303_s2 = inlined_call_operand.vmem [shape: f32[8,1], index: 2, kind: input, shape index: {}]   ;;  %s1304_s5 = inlined_call_operand.vmem [shape: f32[8,512], index: 5, kind: output, shape index: {0}]   ;;  %s1305_s4 = inlined_call_operand.vmem [shape: f32[1,32], index: 4, kind: input, shape index: {}]   ;;  %s1306_s6 = inlined_call_operand.vmem [shape: f32[1,32], index: 6, kind: output, shape index: {1}]  }
   0x1   :  { %v40_v0 = vld [vmem:[%s1300_s0 + $0x88] sm:$0xff]  ;;  %v42_v1 = vld [vmem:[%s1300_s0 + $0x98] sm:$0xff]  ;;  %v39_v2 = vld [vmem:[%s1300_s0 + $0x80] sm:$0xff]  ;;  %117 = vmatprep.mubr.f32.mxu0 %v785_v3  ;;  %188 = vmatprep.mubr.f32.mxu1 %v785_v3 }
   0x2   :  { %75 = vmatprep.subr.mxu0 %v40_v0  ;;  %146 = vmatprep.subr.mxu1 %v42_v1  ;;  %v41_v4 = vld [vmem:[%s1300_s0 + $0x90] sm:$0xff]  ;;  %v36_v5 = vld [vmem:[%s1300_s0 + $0x68] sm:$0xff]  ;;  %v38_v6 = vld [vmem:[%s1300_s0 + $0x78] sm:$0xff] }
   0x3   :  { %76 = vmatpush1.msra.mxu0 %v39_v2  ;;  %147 = vmatpush1.msra.mxu1 %v41_v4  ;;  %v35_v7 = vld [vmem:[%s1300_s0 + $0x60] sm:$0xff]  ;;  %v37_v8 = vld [vmem:[%s1300_s0 + $0x70] sm:$0xff]  ;;  %v32_v9 = vld [vmem:[%s1300_s0 + $0x48] sm:$0xff] }
   0x4   :  { %77 = vmatprep.subr.mxu0 %v36_v5  ;;  %148 = vmatprep.subr.mxu1 %v38_v6  ;;  %v34_v10 = vld [vmem:[%s1300_s0 + $0x58] sm:$0xff]  ;;  %v31_v11 = vld [vmem:[%s1300_s0 + $0x40] sm:$0xff]  ;;  %v33_v12 = vld [vmem:[%s1300_s0 + $0x50] sm:$0xff] }
   0x5   :  { %78 = vmatpush1.msra.mxu0 %v35_v7  ;;  %149 = vmatpush1.msra.mxu1 %v37_v8  ;;  %v28_v13 = vld [vmem:[%s1300_s0 + $0x28] sm:$0xff]  ;;  %v30_v14 = vld [vmem:[%s1300_s0 + $0x38] sm:$0xff]  ;;  %v27_v15 = vld [vmem:[%s1300_s0 + $0x20] sm:$0xff] }
   0x6   :  { %79 = vmatprep.subr.mxu0 %v32_v9  ;;  %150 = vmatprep.subr.mxu1 %v34_v10  ;;  %v29_v16 = vld [vmem:[%s1300_s0 + $0x30] sm:$0xff]  ;;  %v24_v17 = vld [vmem:[%s1300_s0 + $0x8] sm:$0xff]  ;;  %v26_v18 = vld [vmem:[%s1300_s0 + $0x18] sm:$0xff] }
   0x7   :  { %80 = vmatpush1.msra.mxu0 %v31_v11  ;;  %151 = vmatpush1.msra.mxu1 %v33_v12  ;;  %v23_v19 = vld [vmem:[%s1300_s0] sm:$0xff]  ;;  %v25_v20 = vld [vmem:[%s1300_s0 + $0x10] sm:$0xff]  ;;  %v252_v22 = vld [vmem:[%s1302_s3 + $0xf8] sm:$0xff] }
   0x8   :  { %81 = vmatprep.subr.mxu0 %v28_v13  ;;  %152 = vmatprep.subr.mxu1 %v30_v14  ;;  %v22_v21 = vld [vmem:[%s1301_s1] sm:$0xff]  ;;  %v284_v24 = vld [vmem:[%s1302_s3 + $0x1f8] sm:$0xff]  ;;  %v251_v28 = vld [vmem:[%s1302_s3 + $0xf0] sm:$0xff] }
   0x9   :  { %82 = vmatpush1.msra.mxu0 %v27_v15  ;;  %153 = vmatpush1.msra.mxu1 %v29_v16  ;;  %v43_v23 = vld [vmem:[%s1303_s2] sm:$0xff]  ;;  %v236_v25 = vld [vmem:[%s1302_s3 + $0x78] sm:$0xff]  ;;  %v283_v29 = vld [vmem:[%s1302_s3 + $0x1f0] sm:$0xff] }
   0xa   :  { %83 = vmatprep.subr.mxu0 %v24_v17  ;;  %154 = vmatprep.subr.mxu1 %v26_v18  ;;  %v268_v26 = vld [vmem:[%s1302_s3 + $0x178] sm:$0xff]  ;;  %v235_v30 = vld [vmem:[%s1302_s3 + $0x70] sm:$0xff]  ;;  %v250_v32 = vld [vmem:[%s1302_s3 + $0xe8] sm:$0xff] }
   0xb   :  { %84 = vmatpush1.msra.mxu0 %v23_v19  ;;  %155 = vmatpush1.msra.mxu1 %v25_v20  ;;  %v267_v31 = vld [vmem:[%s1302_s3 + $0x170] sm:$0xff]  ;;  %v282_v33 = vld [vmem:[%s1302_s3 + $0x1e8] sm:$0xff]  ;;  %v249_v36 = vld [vmem:[%s1302_s3 + $0xe0] sm:$0xff] }
   0xc   :  { %640 = vmatmul.mubr.msk.f32.vlgmr.msra.gmra.mxu0 %vm49_vm0, %v22_v21  ;;  %641 = vmatmul.mubr.msk.f32.vlgmr.msra.gmra.mxu1 %vm49_vm0, %v22_v21  ;;  %v234_v34 = vld [vmem:[%s1302_s3 + $0x68] sm:$0xff]  ;;  %v281_v37 = vld [vmem:[%s1302_s3 + $0x1e0] sm:$0xff]  ;;  %v248_v40 = vld [vmem:[%s1302_s3 + $0xd8] sm:$0xff] }
   0xd   :  { %784 = vset.pattern.permute.xlu0 %v786_v27  ;;  %642 = vmatprep.subr.mxu0 %v252_v22  ;;  %v266_v35 = vld [vmem:[%s1302_s3 + $0x168] sm:$0xff]  ;;  %v233_v38 = vld [vmem:[%s1302_s3 + $0x60] sm:$0xff]  ;;  %v280_v41 = vld [vmem:[%s1302_s3 + $0x1d8] sm:$0xff] }
   0xe   :  { %46 = vperm.xlu0 %784, %v43_v23   ;;  %677 = vmatprep.subr.mxu1 %v284_v24  ;;  %v265_v39 = vld [vmem:[%s1302_s3 + $0x160] sm:$0xff]  ;;  %v232_v42 = vld [vmem:[%s1302_s3 + $0x58] sm:$0xff]  ;;  %v247_v44 = vld [vmem:[%s1302_s3 + $0xd0] sm:$0xff] }
   0xf   :  { %643 = vmatpush3.msra.mxu0 %v236_v25  ;;  %678 = vmatpush3.msra.mxu1 %v268_v26  ;;  %v264_v43 = vld [vmem:[%s1302_s3 + $0x158] sm:$0xff]  ;;  %v279_v45 = vld [vmem:[%s1302_s3 + $0x1d0] sm:$0xff]  ;;  %v246_v48 = vld [vmem:[%s1302_s3 + $0xc8] sm:$0xff] }
  0x10   :  { %644 = vmatprep.subr.mxu0 %v251_v28  ;;  %679 = vmatprep.subr.mxu1 %v283_v29  ;;  %v231_v46 = vld [vmem:[%s1302_s3 + $0x50] sm:$0xff]  ;;  %v278_v49 = vld [vmem:[%s1302_s3 + $0x1c8] sm:$0xff]  ;;  %v245_v52 = vld [vmem:[%s1302_s3 + $0xc0] sm:$0xff] }
  0x11   :  { %645 = vmatpush3.msra.mxu0 %v235_v30  ;;  %680 = vmatpush3.msra.mxu1 %v267_v31  ;;  %v263_v47 = vld [vmem:[%s1302_s3 + $0x150] sm:$0xff]  ;;  %v230_v50 = vld [vmem:[%s1302_s3 + $0x48] sm:$0xff]  ;;  %v277_v53 = vld [vmem:[%s1302_s3 + $0x1c0] sm:$0xff] }
  0x12   :  { %646 = vmatprep.subr.mxu0 %v250_v32  ;;  %681 = vmatprep.subr.mxu1 %v282_v33  ;;  %v262_v51 = vld [vmem:[%s1302_s3 + $0x148] sm:$0xff]  ;;  %v229_v54 = vld [vmem:[%s1302_s3 + $0x40] sm:$0xff]  ;;  %v244_v56 = vld [vmem:[%s1302_s3 + $0xb8] sm:$0xff] }
  0x13   :  { %647 = vmatpush3.msra.mxu0 %v234_v34  ;;  %682 = vmatpush3.msra.mxu1 %v266_v35  ;;  %v261_v55 = vld [vmem:[%s1302_s3 + $0x140] sm:$0xff]  ;;  %v276_v57 = vld [vmem:[%s1302_s3 + $0x1b8] sm:$0xff]  ;;  %v243_v60 = vld [vmem:[%s1302_s3 + $0xb0] sm:$0xff] }
  0x14   :  { %648 = vmatprep.subr.mxu0 %v249_v36  ;;  %683 = vmatprep.subr.mxu1 %v281_v37  ;;  %v228_v58 = vld [vmem:[%s1302_s3 + $0x38] sm:$0xff]  ;;  %v275_v61 = vld [vmem:[%s1302_s3 + $0x1b0] sm:$0xff]  ;;  %v242_v0 = vld [vmem:[%s1302_s3 + $0xa8] sm:$0xff] }
  0x15   :  { %649 = vmatpush3.msra.mxu0 %v233_v38  ;;  %684 = vmatpush3.msra.mxu1 %v265_v39  ;;  %v260_v59 = vld [vmem:[%s1302_s3 + $0x138] sm:$0xff]  ;;  %v227_v62 = vld [vmem:[%s1302_s3 + $0x30] sm:$0xff]  ;;  %v274_v1 = vld [vmem:[%s1302_s3 + $0x1a8] sm:$0xff] }
  0x16   :  { %650 = vmatprep.subr.mxu0 %v248_v40  ;;  %685 = vmatprep.subr.mxu1 %v280_v41  ;;  %v259_v63 = vld [vmem:[%s1302_s3 + $0x130] sm:$0xff]  ;;  %v226_v2 = vld [vmem:[%s1302_s3 + $0x28] sm:$0xff]  ;;  %v241_v4 = vld [vmem:[%s1302_s3 + $0xa0] sm:$0xff] }
  0x17   :  { %651 = vmatpush3.msra.mxu0 %v232_v42  ;;  %686 = vmatpush3.msra.mxu1 %v264_v43  ;;  %v258_v3 = vld [vmem:[%s1302_s3 + $0x128] sm:$0xff]  ;;  %v273_v5 = vld [vmem:[%s1302_s3 + $0x1a0] sm:$0xff]  ;;  %v240_v8 = vld [vmem:[%s1302_s3 + $0x98] sm:$0xff] }
  0x18   :  { %652 = vmatprep.subr.mxu0 %v247_v44  ;;  %687 = vmatprep.subr.mxu1 %v279_v45  ;;  %v225_v6 = vld [vmem:[%s1302_s3 + $0x20] sm:$0xff]  ;;  %v272_v9 = vld [vmem:[%s1302_s3 + $0x198] sm:$0xff]  ;;  %v239_v12 = vld [vmem:[%s1302_s3 + $0x90] sm:$0xff] }
  0x19   :  { %653 = vmatpush3.msra.mxu0 %v231_v46  ;;  %688 = vmatpush3.msra.mxu1 %v263_v47  ;;  %v257_v7 = vld [vmem:[%s1302_s3 + $0x120] sm:$0xff]  ;;  %v224_v10 = vld [vmem:[%s1302_s3 + $0x18] sm:$0xff]  ;;  %v271_v13 = vld [vmem:[%s1302_s3 + $0x190] sm:$0xff] }
  0x1a   :  { %654 = vmatprep.subr.mxu0 %v246_v48  ;;  %689 = vmatprep.subr.mxu1 %v278_v49  ;;  %v256_v11 = vld [vmem:[%s1302_s3 + $0x118] sm:$0xff]  ;;  %v223_v14 = vld [vmem:[%s1302_s3 + $0x10] sm:$0xff]  ;;  %v238_v16 = vld [vmem:[%s1302_s3 + $0x88] sm:$0xff] }
  0x1b   :  { %655 = vmatpush3.msra.mxu0 %v230_v50  ;;  %690 = vmatpush3.msra.mxu1 %v262_v51  ;;  %v255_v15 = vld [vmem:[%s1302_s3 + $0x110] sm:$0xff]  ;;  %v270_v17 = vld [vmem:[%s1302_s3 + $0x188] sm:$0xff]  ;;  %v237_v20 = vld [vmem:[%s1302_s3 + $0x80] sm:$0xff] }
  0x1c   :  { %656 = vmatprep.subr.mxu0 %v245_v52  ;;  %691 = vmatprep.subr.mxu1 %v277_v53  ;;  %v222_v18 = vld [vmem:[%s1302_s3 + $0x8] sm:$0xff]  ;;  %v269_v21 = vld [vmem:[%s1302_s3 + $0x180] sm:$0xff]  ;;  %v316_v24 = vld [vmem:[%s1302_s3 + $0x2f8] sm:$0xff] }
  0x1d   :  { %657 = vmatpush3.msra.mxu0 %v229_v54  ;;  %692 = vmatpush3.msra.mxu1 %v261_v55  ;;  %v254_v19 = vld [vmem:[%s1302_s3 + $0x108] sm:$0xff]  ;;  %v221_v22 = vld [vmem:[%s1302_s3] sm:$0xff]  ;;  %v348_v25 = vld [vmem:[%s1302_s3 + $0x3f8] sm:$0xff] }
  0x1e   :  { %658 = vmatprep.subr.mxu0 %v244_v56  ;;  %693 = vmatprep.subr.mxu1 %v276_v57  ;;  %v253_v23 = vld [vmem:[%s1302_s3 + $0x100] sm:$0xff]  ;;  %v300_v45 = vld [vmem:[%s1302_s3 + $0x278] sm:$0xff]  ;;  %v315_v47 = vld [vmem:[%s1302_s3 + $0x2f0] sm:$0xff] }
  0x1f   :  { %659 = vmatpush3.msra.mxu0 %v228_v58  ;;  %694 = vmatpush3.msra.mxu1 %v260_v59  ;;  %v332_v46 = vld [vmem:[%s1302_s3 + $0x378] sm:$0xff]  ;;  %v347_v49 = vld [vmem:[%s1302_s3 + $0x3f0] sm:$0xff]  ;;  %v314_v53 = vld [vmem:[%s1302_s3 + $0x2e8] sm:$0xff] }
  0x20   :  { %660 = vmatprep.subr.mxu0 %v243_v60  ;;  %695 = vmatprep.subr.mxu1 %v275_v61  ;;  %v299_v51 = vld [vmem:[%s1302_s3 + $0x270] sm:$0xff]  ;;  %v346_v54 = vld [vmem:[%s1302_s3 + $0x3e8] sm:$0xff]  ;;  %v313_v57 = vld [vmem:[%s1302_s3 + $0x2e0] sm:$0xff] }
  0x21   :  { %661 = vmatpush3.msra.mxu0 %v227_v62  ;;  %696 = vmatpush3.msra.mxu1 %v259_v63  ;;  %v331_v52 = vld [vmem:[%s1302_s3 + $0x370] sm:$0xff]  ;;  %v298_v55 = vld [vmem:[%s1302_s3 + $0x268] sm:$0xff]  ;;  %v345_v58 = vld [vmem:[%s1302_s3 + $0x3e0] sm:$0xff] }
  0x22   :  { %662 = vmatprep.subr.mxu0 %v242_v0  ;;  %697 = vmatprep.subr.mxu1 %v274_v1  ;;  %v330_v56 = vld [vmem:[%s1302_s3 + $0x368] sm:$0xff]  ;;  %v297_v59 = vld [vmem:[%s1302_s3 + $0x260] sm:$0xff]  ;;  %v312_v61 = vld [vmem:[%s1302_s3 + $0x2d8] sm:$0xff] }
  0x23   :  { %663 = vmatpush3.msra.mxu0 %v226_v2  ;;  %698 = vmatpush3.msra.mxu1 %v258_v3  ;;  %v329_v60 = vld [vmem:[%s1302_s3 + $0x360] sm:$0xff]  ;;  %v344_v62 = vld [vmem:[%s1302_s3 + $0x3d8] sm:$0xff]  ;;  %v311_v1 = vld [vmem:[%s1302_s3 + $0x2d0] sm:$0xff] }
  0x24   :  { %664 = vmatprep.subr.mxu0 %v241_v4  ;;  %699 = vmatprep.subr.mxu1 %v273_v5  ;;  %v296_v63 = vld [vmem:[%s1302_s3 + $0x258] sm:$0xff]  ;;  %v343_v2 = vld [vmem:[%s1302_s3 + $0x3d0] sm:$0xff]  ;;  %v310_v5 = vld [vmem:[%s1302_s3 + $0x2c8] sm:$0xff] }
  0x25   :  { %665 = vmatpush3.msra.mxu0 %v225_v6  ;;  %700 = vmatpush3.msra.mxu1 %v257_v7  ;;  %v328_v0 = vld [vmem:[%s1302_s3 + $0x358] sm:$0xff]  ;;  %v295_v3 = vld [vmem:[%s1302_s3 + $0x250] sm:$0xff]  ;;  %v342_v6 = vld [vmem:[%s1302_s3 + $0x3c8] sm:$0xff] }
  0x26   :  { %666 = vmatprep.subr.mxu0 %v240_v8  ;;  %701 = vmatprep.subr.mxu1 %v272_v9  ;;  %v327_v4 = vld [vmem:[%s1302_s3 + $0x350] sm:$0xff]  ;;  %v294_v7 = vld [vmem:[%s1302_s3 + $0x248] sm:$0xff]  ;;  %v309_v9 = vld [vmem:[%s1302_s3 + $0x2c0] sm:$0xff] }
  0x27   :  { %667 = vmatpush3.msra.mxu0 %v224_v10  ;;  %702 = vmatpush3.msra.mxu1 %v256_v11  ;;  %v326_v8 = vld [vmem:[%s1302_s3 + $0x348] sm:$0xff]  ;;  %v341_v10 = vld [vmem:[%s1302_s3 + $0x3c0] sm:$0xff] }
  0x28   :  { %668 = vmatprep.subr.mxu0 %v239_v12  ;;  %703 = vmatprep.subr.mxu1 %v271_v13  ;;  %v293_v11 = vld [vmem:[%s1302_s3 + $0x240] sm:$0xff]  ;;  %v308_v13 = vld [vmem:[%s1302_s3 + $0x2b8] sm:$0xff] }
  0x29   :  { %669 = vmatpush3.msra.mxu0 %v223_v14  ;;  %704 = vmatpush3.msra.mxu1 %v255_v15  ;;  %v325_v12 = vld [vmem:[%s1302_s3 + $0x340] sm:$0xff]  ;;  %v340_v14 = vld [vmem:[%s1302_s3 + $0x3b8] sm:$0xff] }
  0x2a   :  { %670 = vmatprep.subr.mxu0 %v238_v16  ;;  %705 = vmatprep.subr.mxu1 %v270_v17  ;;  %v292_v15 = vld [vmem:[%s1302_s3 + $0x238] sm:$0xff]  ;;  %v307_v17 = vld [vmem:[%s1302_s3 + $0x2b0] sm:$0xff] }
  0x2b   :  { %671 = vmatpush3.msra.mxu0 %v222_v18  ;;  %706 = vmatpush3.msra.mxu1 %v254_v19  ;;  %v324_v16 = vld [vmem:[%s1302_s3 + $0x338] sm:$0xff]  ;;  %v339_v18 = vld [vmem:[%s1302_s3 + $0x3b0] sm:$0xff] }
  0x2c   :  { %672 = vmatprep.subr.mxu0 %v237_v20  ;;  %707 = vmatprep.subr.mxu1 %v269_v21  ;;  %v291_v19 = vld [vmem:[%s1302_s3 + $0x230] sm:$0xff]  ;;  %v306_v21 = vld [vmem:[%s1302_s3 + $0x2a8] sm:$0xff] }
  0x2d   :  { %673 = vmatpush3.msra.mxu0 %v221_v22  ;;  %708 = vmatpush3.msra.mxu1 %v253_v23  ;;  %v323_v20 = vld [vmem:[%s1302_s3 + $0x330] sm:$0xff]  ;;  %v338_v22 = vld [vmem:[%s1302_s3 + $0x3a8] sm:$0xff] }
  0x2e   :  { %712 = vmatprep.subr.mxu0 %v316_v24  ;;  %747 = vmatprep.subr.mxu1 %v348_v25  ;;  %v290_v23 = vld [vmem:[%s1302_s3 + $0x228] sm:$0xff]  ;;  %v305_v25 = vld [vmem:[%s1302_s3 + $0x2a0] sm:$0xff] }
  0x2f   :  { %v322_v24 = vld [vmem:[%s1302_s3 + $0x328] sm:$0xff] }
  0x89   :  { %v47_v26 = vpop.permute.xlu0 %46 }
  0xcc   :  { %v119_v27 = vpop.f32.mrf.mxu0  ;;  %v190_v28 = vpop.f32.mrf.mxu1 }
  0xcd   :  { %v120_v29 = vadd.f32 %v119_v27, %v47_v26  ;;  %v191_v30 = vadd.f32 %v190_v28, %v47_v26  ;;  %v289_v27 = vld [vmem:[%s1302_s3 + $0x220] sm:$0xff] }
  0xce   :  { %v121_v31 = vpop.f32.mrf.mxu0  ;;  %v192_v32 = vpop.f32.mrf.mxu1  ;;  %v321_v28 = vld [vmem:[%s1302_s3 + $0x320] sm:$0xff] }
  0xcf   :  { %195 = vst [vmem:[%s1304_s5] sm:$0xff] %v120_v29  ;;  %197 = vst [vmem:[%s1304_s5 + $0x10] sm:$0xff] %v191_v30  ;;  %v122_v33 = vadd.f32 %v121_v31, %v47_v26  ;;  %v193_v34 = vadd.f32 %v192_v32, %v47_v26  ;;  %v199_v35 = vmax.f32 %v120_v29, 0.0  ;;  %v201_v36 = vmax.f32 %v191_v30, 0.0  ;;  %v337_v26 = vld [vmem:[%s1302_s3 + $0x3a0] sm:$0xff]  ;;  %v304_v29 = vld [vmem:[%s1302_s3 + $0x298] sm:$0xff] }
  0xd0   :  { %v336_v30 = vld [vmem:[%s1302_s3 + $0x398] sm:$0xff] }
  0xd1   :  { %196 = vst [vmem:[%s1304_s5 + $0x8] sm:$0xff] %v122_v33  ;;  %v200_v37 = vmax.f32 %v122_v33, 0.0  ;;  %198 = vst [vmem:[%s1304_s5 + $0x18] sm:$0xff] %v193_v34  ;;  %v202_v38 = vmax.f32 %v193_v34, 0.0  ;;  %v288_v31 = vld [vmem:[%s1302_s3 + $0x218] sm:$0xff]  ;;  %v303_v33 = vld [vmem:[%s1302_s3 + $0x290] sm:$0xff] }
  0xd2   :  { %v320_v32 = vld [vmem:[%s1302_s3 + $0x318] sm:$0xff]  ;;  %v335_v34 = vld [vmem:[%s1302_s3 + $0x390] sm:$0xff] }
  0xd3   :  { %v203_v39 = vmax.f32 %v199_v35, %v200_v37  ;;  %v204_v40 = vmax.f32 %v201_v36, %v202_v38  ;;  %v287_v35 = vld [vmem:[%s1302_s3 + $0x210] sm:$0xff]  ;;  %v302_v37 = vld [vmem:[%s1302_s3 + $0x288] sm:$0xff] }
  0xd4   :  { %v319_v36 = vld [vmem:[%s1302_s3 + $0x310] sm:$0xff]  ;;  %v334_v38 = vld [vmem:[%s1302_s3 + $0x388] sm:$0xff] }
  0xd5   :  { %v1098_v41 = vmax.f32 %v203_v39, %v204_v40  ;;  %v286_v39 = vld [vmem:[%s1302_s3 + $0x208] sm:$0xff] }
  0xd6   :  { %v318_v40 = vld [vmem:[%s1302_s3 + $0x308] sm:$0xff] }
  0xd7   :  { %v207_v42 = vrot.slane %v1098_v41, 1  ;;  %v211_v43 = vrot.slane %v1098_v41, 3  ;;  %v209_v44 = vrot.slane %v1098_v41, 2  ;;  %v215_v48 = vrot.slane %v1098_v41, 5 }
  0xd8   :  { %v219_v50 = vrot.slane %v1098_v41, 7 }
  0xd9   :  { %414 = vmatprep.mubr.f32.mxu0 %v207_v42  ;;  %484 = vmatprep.mubr.f32.mxu1 %v211_v43  ;;  %v301_v42 = vld [vmem:[%s1302_s3 + $0x280] sm:$0xff] }
  0xda   :  { %415 = vmatmul.mubr.f32.vlgmr.msra.gmra.mxu0 %v1098_v41  ;;  %485 = vmatmul.mubr.f32.vlgmr.msra.gmra.mxu1 %v209_v44  ;;  %v333_v43 = vld [vmem:[%s1302_s3 + $0x380] sm:$0xff] }
  0xdb   :  { %713 = vmatpush3.msra.mxu0 %v300_v45  ;;  %748 = vmatpush3.msra.mxu1 %v332_v46  ;;  %v285_v44 = vld [vmem:[%s1302_s3 + $0x200] sm:$0xff]  ;;  %v213_v46 = vrot.slane %v1098_v41, 4 }
  0xdc   :  { %714 = vmatprep.subr.mxu0 %v315_v47  ;;  %554 = vmatprep.mubr.f32.mxu0 %v215_v48  ;;  %v317_v45 = vld [vmem:[%s1302_s3 + $0x300] sm:$0xff]  ;;  %v217_v47 = vrot.slane %v1098_v41, 6 }
  0xdd   :  { %749 = vmatprep.subr.mxu1 %v347_v49  ;;  %624 = vmatprep.mubr.f32.mxu1 %v219_v50 }
  0xde   :  { %715 = vmatpush3.msra.mxu0 %v299_v51  ;;  %750 = vmatpush3.msra.mxu1 %v331_v52  ;;  %v349_v52 = vld [vmem:[%s1305_s4] sm:$0x1] }
  0xdf   :  { %716 = vmatprep.subr.mxu0 %v314_v53  ;;  %751 = vmatprep.subr.mxu1 %v346_v54 }
  0xe0   :  { %717 = vmatpush3.msra.mxu0 %v298_v55  ;;  %752 = vmatpush3.msra.mxu1 %v330_v56 }
  0xe1   :  { %718 = vmatprep.subr.mxu0 %v313_v57  ;;  %753 = vmatprep.subr.mxu1 %v345_v58 }
  0xe2   :  { %719 = vmatpush3.msra.mxu0 %v297_v59  ;;  %754 = vmatpush3.msra.mxu1 %v329_v60 }
  0xe3   :  { %720 = vmatprep.subr.mxu0 %v312_v61  ;;  %755 = vmatprep.subr.mxu1 %v344_v62 }
  0xe4   :  { %721 = vmatpush3.msra.mxu0 %v296_v63  ;;  %756 = vmatpush3.msra.mxu1 %v328_v0 }
  0xe5   :  { %722 = vmatprep.subr.mxu0 %v311_v1  ;;  %757 = vmatprep.subr.mxu1 %v343_v2 }
  0xe6   :  { %723 = vmatpush3.msra.mxu0 %v295_v3  ;;  %758 = vmatpush3.msra.mxu1 %v327_v4 }
  0xe7   :  { %724 = vmatprep.subr.mxu0 %v310_v5  ;;  %759 = vmatprep.subr.mxu1 %v342_v6 }
  0xe8   :  { %725 = vmatpush3.msra.mxu0 %v294_v7  ;;  %760 = vmatpush3.msra.mxu1 %v326_v8 }
  0xe9   :  { %726 = vmatprep.subr.mxu0 %v309_v9  ;;  %761 = vmatprep.subr.mxu1 %v341_v10 }
  0xea   :  { %727 = vmatpush3.msra.mxu0 %v293_v11  ;;  %762 = vmatpush3.msra.mxu1 %v325_v12 }
  0xeb   :  { %728 = vmatprep.subr.mxu0 %v308_v13  ;;  %763 = vmatprep.subr.mxu1 %v340_v14 }
  0xec   :  { %729 = vmatpush3.msra.mxu0 %v292_v15  ;;  %764 = vmatpush3.msra.mxu1 %v324_v16 }
  0xed   :  { %730 = vmatprep.subr.mxu0 %v307_v17  ;;  %765 = vmatprep.subr.mxu1 %v339_v18 }
  0xee   :  { %731 = vmatpush3.msra.mxu0 %v291_v19  ;;  %766 = vmatpush3.msra.mxu1 %v323_v20 }
  0xef   :  { %732 = vmatprep.subr.mxu0 %v306_v21  ;;  %767 = vmatprep.subr.mxu1 %v338_v22 }
  0xf0   :  { %733 = vmatpush3.msra.mxu0 %v290_v23  ;;  %768 = vmatpush3.msra.mxu1 %v322_v24 }
  0xf1   :  { %734 = vmatprep.subr.mxu0 %v305_v25  ;;  %769 = vmatprep.subr.mxu1 %v337_v26 }
  0xf2   :  { %735 = vmatpush3.msra.mxu0 %v289_v27  ;;  %770 = vmatpush3.msra.mxu1 %v321_v28 }
  0xf3   :  { %736 = vmatprep.subr.mxu0 %v304_v29  ;;  %771 = vmatprep.subr.mxu1 %v336_v30 }
  0xf4   :  { %737 = vmatpush3.msra.mxu0 %v288_v31  ;;  %772 = vmatpush3.msra.mxu1 %v320_v32 }
  0xf5   :  { %738 = vmatprep.subr.mxu0 %v303_v33  ;;  %773 = vmatprep.subr.mxu1 %v335_v34 }
  0xf6   :  { %739 = vmatpush3.msra.mxu0 %v287_v35  ;;  %774 = vmatpush3.msra.mxu1 %v319_v36 }
  0xf7   :  { %740 = vmatprep.subr.mxu0 %v302_v37  ;;  %775 = vmatprep.subr.mxu1 %v334_v38 }
  0xf8   :  { %741 = vmatpush3.msra.mxu0 %v286_v39  ;;  %776 = vmatpush3.msra.mxu1 %v318_v40 }
  0xf9   :  { %742 = vmatprep.subr.mxu0 %v301_v42  ;;  %777 = vmatprep.subr.mxu1 %v333_v43 }
  0xfa   :  { %743 = vmatpush3.msra.mxu0 %v285_v44  ;;  %778 = vmatpush3.msra.mxu1 %v317_v45 }
  0xfb   :  { %555 = vmatmul.mubr.f32.vlgmr.msra.gmra.mxu0 %v213_v46  ;;  %625 = vmatmul.mubr.f32.vlgmr.msra.gmra.mxu1 %v217_v47 }
 0x19a   :  { %v674_v48 = vpop.f32.mrf.mxu0  ;;  %v709_v50 = vpop.f32.mrf.mxu1 }
 0x19c   :  { %v675_v49 = vpop.f32.mrf.mxu0  ;;  %v710_v53 = vpop.f32.mrf.mxu1 }
 0x19d   :  { %v676_v51 = vadd.f32 %v675_v49, %v674_v48  ;;  %v711_v57 = vadd.f32 %v710_v53, %v709_v50 }
 0x19f   :  { %v417_v54 = vadd.f32 %v676_v51, %v349_v52 }
 0x1a1   :  { %v487_v41 = vadd.f32 %v711_v57, %v417_v54 }
 0x1bb   :  { %v744_v55 = vpop.f32.mrf.mxu0  ;;  %v779_v56 = vpop.f32.mrf.mxu1 }
 0x1bd   :  { %v745_v58 = vpop.f32.mrf.mxu0  ;;  %v780_v59 = vpop.f32.mrf.mxu1 }
 0x1be   :  { %v746_v60 = vadd.f32 %v745_v58, %v744_v55  ;;  %v781_v62 = vadd.f32 %v780_v59, %v779_v56 }
 0x1c0   :  { %v557_v61 = vadd.f32 %v746_v60, %v487_v41 }
 0x1c2   :  { %v627_v63 = vadd.f32 %v781_v62, %v557_v61 }
 0x1c4   :  { %631 = vst.msk [vmem:[%s1306_s6] sm:$0x1] %vm630_vm1, %v627_v63 }

</bundles_post_ra>
